<compile_context>
chip_gen: v7x
topology: tpu7x:2x2x1
jax: 0.10.0
libtpu: 0.0.40
codegen_flags: <defaults>
</compile_context>

<pallas_src>
import functools

import jax
import jax.numpy as jnp
from jax.experimental import pallas as pl
from jax.experimental.pallas import tpu as pltpu


def _linear_relu_kernel(x_ref, w_ref, b_ref, o_ref):
    # x_ref: (tm, K), w_ref: (K, N) [pre-packed, already transposed],
    # b_ref: (1, N) f32, o_ref: (tm, N).
    acc = jnp.dot(x_ref[...], w_ref[...], preferred_element_type=jnp.float32)
    acc = acc + b_ref[...]                       # broadcast (1, N) over rows
    o_ref[...] = jnp.maximum(acc, 0.0).astype(o_ref.dtype)


def _round_up(x, m):
    return ((x + m - 1) // m) * m


@functools.partial(jax.jit, static_argnames=("block_m",))
def embedding_net_forward(x, weight, bias, *, block_m=8192):
    """Forward pass of EmbeddingNet: ReLU(x @ weight.T + bias).

    x:      [B, D_in]
    weight: [D_out, D_in]   (PyTorch nn.Linear layout)
    bias:   [D_out]
    returns [B, D_out]      (x.dtype)
    """
    B, D_in = x.shape
    D_out = weight.shape[0]
    out_dtype = x.dtype
    itemsize = jnp.dtype(x.dtype).itemsize

    # ---- Lane-packing decision --------------------------------------------
    # Fold P=8 logical rows into one lane-dense packed row whenever the
    # block-diagonal weight (P^2 * D_in * D_out elements) stays small.
    P = 8
    if P * P * D_in * D_out * itemsize > (4 << 20):
        P = 1                       # fallback: plain [B, D_in] @ [D_in, D_out]
    K = P * D_in
    N = P * D_out

    # ---- Wrapper-side packing (one-time / zero-copy) -----------------------
    b_pad = _round_up(B, P)          # packed view needs a multiple of P rows
    if b_pad != B:
        x = jnp.pad(x, ((0, b_pad - B), (0, 0)))
    rows = b_pad // P
    x_p = x.reshape(rows, K)         # same bytes, row-major view (no copy)

    w_t = weight.T.astype(x.dtype)   # no-op when dtypes already match
    if P == 1:
        w_p = w_t
    else:
        # Block-diagonal: P copies of W^T on the diagonal -> lane-dense K, N.
        w_p = jnp.kron(jnp.eye(P, dtype=w_t.dtype), w_t)
    b_p = jnp.tile(bias.reshape(1, D_out), (1, P)).astype(jnp.float32)

    # ---- Tile selection -----------------------------------------------------
    # tm is in packed rows. Caps:
    #   * block_m logical rows (grid-overhead amortization),
    #   * a 12 MiB VMEM budget (double-buffered x+out tiles + resident weight),
    #     conservative even for v5e's 16 MiB default scoped VMEM,
    #   * ~half the rows so the "parallel" axis has >= 2 steps (v7x megacore).
    tm = _round_up(max(block_m // P, 1), 8)
    vmem_budget = 12 << 20
    row_bytes = 2 * itemsize * (K + N)                    # double-buffered in+out
    avail = vmem_budget - itemsize * (K * N) - 4 * N
    tm = min(tm, max(8, (avail // row_bytes) // 8 * 8))
    tm = min(tm, _round_up(pl.cdiv(rows, 2), 8))
    if tm >= rows:
        tm = rows                                          # single full-extent block
    grid_m = pl.cdiv(rows, tm)                             # masked final tile if ragged

    cost = pl.CostEstimate(
        flops=2 * rows * K * N,
        bytes_accessed=itemsize * (rows * K + K * N + rows * N) + 4 * N,
        transcendentals=0,
    )

    out_p = pl.pallas_call(
        _linear_relu_kernel,
        out_shape=jax.ShapeDtypeStruct((rows, N), out_dtype),
        grid_spec=pltpu.PrefetchScalarGridSpec(
            num_scalar_prefetch=0,
            grid=(grid_m,),
            in_specs=[
                # x: tiled over packed rows -> double-buffered DMA per step.
                pl.BlockSpec((tm, K), lambda i: (i, 0)),
                # weight / bias: constant block index -> DMA'd once, resident.
                pl.BlockSpec((K, N), lambda i: (0, 0)),
                pl.BlockSpec((1, N), lambda i: (0, 0)),
            ],
            out_specs=pl.BlockSpec((tm, N), lambda i: (i, 0)),
        ),
        compiler_params=pltpu.CompilerParams(
            dimension_semantics=("parallel",),   # megacore sharding on v7x
        ),
        cost_estimate=cost,
    )(x_p, w_p, b_p)

    out = out_p.reshape(b_pad, D_out)
    if b_pad != B:
        out = out[:B]
    return out


if __name__ == "__main__":
    # Small shapes consistent with the module: batch=8, input_dim=32, output_dim=16.
    B, D_in, D_out = 8, 32, 16

    key = jax.random.PRNGKey(0)
    kx, kw, kb, kx2 = jax.random.split(key, 4)

    # Deterministic parameter init (mimics nn.Linear's U(-1/sqrt(in), 1/sqrt(in))).
    bound = 1.0 / jnp.sqrt(jnp.float32(D_in))
    weight = jax.random.uniform(kw, (D_out, D_in), jnp.float32, -bound, bound)
    bias = jax.random.uniform(kb, (D_out,), jnp.float32, -bound, bound)
    x = jax.random.normal(kx, (B, D_in), jnp.float32)

    out = jax.block_until_ready(embedding_net_forward(x, weight, bias))
    ref = jnp.maximum(x @ weight.T + bias, 0.0)
    assert out.shape == (B, D_out)
    assert jnp.allclose(out, ref, atol=1e-5, rtol=1e-5)

    # Also exercise the multi-step grid + masked final tile path.
    x2 = jax.random.normal(kx2, (200, D_in), jnp.float32)
    out2 = jax.block_until_ready(embedding_net_forward(x2, weight, bias, block_m=64))
    ref2 = jnp.maximum(x2 @ weight.T + bias, 0.0)
    assert out2.shape == (200, D_out)
    assert jnp.allclose(out2, ref2, atol=1e-5, rtol=1e-5)

    print("KERNEL_OK")
</pallas_src>

<mosaic_0001>
module attributes {stable_mosaic.version = 11 : i64} {
  func.func @_linear_relu_kernel(%arg0: i32, %arg1: memref<1x256xf32, #tpu.memory_space<vmem>>, %arg2: memref<256x128xf32, #tpu.memory_space<vmem>>, %arg3: memref<1x128xf32, #tpu.memory_space<vmem>>, %arg4: memref<1x128xf32, #tpu.memory_space<vmem>>) attributes {dimension_semantics = [#tpu.dimension_semantics<parallel>], iteration_bounds = array<i64: 1>, scalar_prefetch = 0 : i64, scratch_operands = 0 : i64, tpu.core_type = #tpu.core_type<tc>, window_params = [{transform_indices = @transform_0, window_bounds = array<i64: 1, 256>}, {pipeline_mode = #tpu.pipeline_mode<synchronous>, transform_indices = @transform_1, window_bounds = array<i64: 256, 128>}, {pipeline_mode = #tpu.pipeline_mode<synchronous>, transform_indices = @transform_2, window_bounds = array<i64: 1, 128>}, {transform_indices = @transform_3, window_bounds = array<i64: 1, 128>}]} {
    %c0 = arith.constant 0 : index
    %c0_0 = arith.constant 0 : index
    %0 = vector.load %arg1[%c0, %c0_0] : memref<1x256xf32, #tpu.memory_space<vmem>>, vector<1x256xf32>
    %c0_1 = arith.constant 0 : index
    %c0_2 = arith.constant 0 : index
    %1 = vector.load %arg2[%c0_1, %c0_2] : memref<256x128xf32, #tpu.memory_space<vmem>>, vector<256x128xf32>
    %cst = arith.constant dense<0.000000e+00> : vector<1x128xf32>
    %2 = tpu.matmul %0, %1, %cst {dimension_numbers = #tpu.dot_dimension_numbers<[1], [0], [0], [1], [0, 0, 1, 1], [], []>} : vector<1x256xf32>, vector<256x128xf32>, vector<1x128xf32> -> vector<1x128xf32>
    %c0_3 = arith.constant 0 : index
    %c0_4 = arith.constant 0 : index
    %3 = vector.load %arg3[%c0_3, %c0_4] : memref<1x128xf32, #tpu.memory_space<vmem>>, vector<1x128xf32>
    %4 = arith.addf %2, %3 : vector<1x128xf32>
    %cst_5 = arith.constant 0.000000e+00 : f32
    %5 = vector.broadcast %cst_5 : f32 to vector<1x128xf32>
    %6 = arith.maximumf %4, %5 : vector<1x128xf32>
    %c0_6 = arith.constant 0 : index
    %c0_7 = arith.constant 0 : index
    %7 = vector.load %arg4[%c0_6, %c0_7] : memref<1x128xf32, #tpu.memory_space<vmem>>, vector<1x128xf32>
    tpu.vector_store %arg4[%c0_6, %c0_7], %6 {strides = array<i32>} : memref<1x128xf32, #tpu.memory_space<vmem>>, vector<1x128xf32>,
    return
  }
  func.func @transform_0(%arg0: i32) -> (i32, i32) {
    %c0_i32 = arith.constant 0 : i32
    %c0_i32_0 = arith.constant 0 : i32
    return %arg0, %c0_i32 : i32, i32
  }
  func.func @transform_1(%arg0: i32) -> (i32, i32) {
    %c0_i32 = arith.constant 0 : i32
    %c0_i32_0 = arith.constant 0 : i32
    %c0_i32_1 = arith.constant 0 : i32
    return %c0_i32, %c0_i32_0 : i32, i32
  }
  func.func @transform_2(%arg0: i32) -> (i32, i32) {
    %c0_i32 = arith.constant 0 : i32
    %c0_i32_0 = arith.constant 0 : i32
    %c0_i32_1 = arith.constant 0 : i32
    return %c0_i32, %c0_i32_0 : i32, i32
  }
  func.func @transform_3(%arg0: i32) -> (i32, i32) {
    %c0_i32 = arith.constant 0 : i32
    %c0_i32_0 = arith.constant 0 : i32
    return %arg0, %c0_i32 : i32, i32
  }
}

</mosaic_0001>

<bundles_post_ra>
// kernel: embedding_net_forward.1
= control target key start
LH: loop header
LB: loop body
LE: loop exit
PB: predicated region body
PF: predicated region fallthrough
CT: control target
= control target key end

     0   :  { %v49_v0 = vlaneseq  ;;  %s327_s1 = inlined_call_operand.vmem [shape: f32[256,128], index: 1, kind: input, shape index: {}]   ;;  %s328_s0 = inlined_call_operand.vmem [shape: f32[1,256], index: 0, kind: input, shape index: {}]   ;;  %s329_s2 = inlined_call_operand.vmem [shape: f32[1,128], index: 2, kind: input, shape index: {}]   ;;  %s330_s3 = inlined_call_operand.vmem [shape: f32[1,128], index: 3, kind: output, shape index: {}]  }
   0x1   :  { %v31_v1 = vld [vmem:[%s327_s1 + $0x80] sm:$0xff]  ;;  %v32_v2 = vld [vmem:[%s327_s1 + $0x88] sm:$0xff]  ;;  %v33_v6 = vld [vmem:[%s327_s1 + $0x90] sm:$0xff] }
   0x2   :  { %v15_v3 = vld [vmem:[%s327_s1] sm:$0xff]  ;;  %v170_v4 = vpack.c.bf16 %v32_v2, %v31_v1  ;;  %v16_v5 = vld [vmem:[%s327_s1 + $0x8] sm:$0xff]  ;;  %v34_v7 = vld [vmem:[%s327_s1 + $0x98] sm:$0xff]  ;;  %v50_v14 = vshrl.u32 %v49_v0, 7 }
   0x3   :  { %v172_v8 = vpack.c.bf16 %v16_v5, %v15_v3  ;;  %v174_v9 = vpack.c.bf16 %v34_v7, %v33_v6  ;;  %v17_v10 = vld [vmem:[%s327_s1 + $0x10] sm:$0xff]  ;;  %v18_v11 = vld [vmem:[%s327_s1 + $0x18] sm:$0xff]  ;;  %v35_v12 = vld [vmem:[%s327_s1 + $0xa0] sm:$0xff] }
   0x4   :  { %171 = vmatprep.subr.bf16.mxu0 %v170_v4  ;;  %v36_v13 = vld [vmem:[%s327_s1 + $0xa8] sm:$0xff]  ;;  %v176_v15 = vpack.c.bf16 %v18_v11, %v17_v10  ;;  %v19_v17 = vld [vmem:[%s327_s1 + $0x20] sm:$0xff]  ;;  %v37_v19 = vld [vmem:[%s327_s1 + $0xb0] sm:$0xff]  ;;  %v55_v21 = vsub.s32 1, %v50_v14  ;;  %v51_v52 = vsub.s32 0, %v50_v14 }
   0x5   :  { %173 = vmatpush3.bf16.msra.mxu0 %v172_v8  ;;  %v178_v16 = vpack.c.bf16 %v36_v13, %v35_v12  ;;  %v20_v18 = vld [vmem:[%s327_s1 + $0x28] sm:$0xff]  ;;  %v38_v20 = vld [vmem:[%s327_s1 + $0xb8] sm:$0xff]  ;;  %v21_v24 = vld [vmem:[%s327_s1 + $0x30] sm:$0xff] }
   0x6   :  { %175 = vmatprep.subr.bf16.mxu0 %v174_v9  ;;  %v180_v22 = vpack.c.bf16 %v20_v18, %v19_v17  ;;  %v182_v23 = vpack.c.bf16 %v38_v20, %v37_v19  ;;  %v22_v25 = vld [vmem:[%s327_s1 + $0x38] sm:$0xff]  ;;  %v39_v26 = vld [vmem:[%s327_s1 + $0xc0] sm:$0xff]  ;;  %v40_v27 = vld [vmem:[%s327_s1 + $0xc8] sm:$0xff] }
   0x7   :  { %v14_v28 = vld [vmem:[%s328_s0] sm:$0x3]  ;;  %v184_v30 = vpack.c.bf16 %v22_v25, %v21_v24  ;;  %v186_v31 = vpack.c.bf16 %v40_v27, %v39_v26  ;;  %v24_v33 = vld [vmem:[%s327_s1 + $0x48] sm:$0xff]  ;;  %v41_v34 = vld [vmem:[%s327_s1 + $0xd0] sm:$0xff] }
   0x8   :  { %v56_v29 = vrot.slane %v14_v28, %v55_v21  ;;  %v23_v32 = vld [vmem:[%s327_s1 + $0x40] sm:$0xff]  ;;  %v42_v35 = vld [vmem:[%s327_s1 + $0xd8] sm:$0xff]  ;;  %v25_v38 = vld [vmem:[%s327_s1 + $0x50] sm:$0xff]  ;;  %v52_v54 = vrot.slane %v14_v28, %v51_v52 }
   0x9   :  { %177 = vmatpush3.bf16.msra.mxu0 %v176_v15  ;;  %v188_v36 = vpack.c.bf16 %v24_v33, %v23_v32  ;;  %v190_v37 = vpack.c.bf16 %v42_v35, %v41_v34  ;;  %v26_v39 = vld [vmem:[%s327_s1 + $0x58] sm:$0xff]  ;;  %v43_v40 = vld [vmem:[%s327_s1 + $0xe0] sm:$0xff]  ;;  %v44_v41 = vld [vmem:[%s327_s1 + $0xe8] sm:$0xff] }
   0xa   :  { %179 = vmatprep.subr.bf16.mxu0 %v178_v16  ;;  %123 = vmatprep.mubr.f32.mxu0 %v56_v29  ;;  %v192_v42 = vpack.c.bf16 %v26_v39, %v25_v38  ;;  %v194_v43 = vpack.c.bf16 %v44_v41, %v43_v40  ;;  %v27_v44 = vld [vmem:[%s327_s1 + $0x60] sm:$0xff]  ;;  %v28_v45 = vld [vmem:[%s327_s1 + $0x68] sm:$0xff]  ;;  %v45_v46 = vld [vmem:[%s327_s1 + $0xf0] sm:$0xff] }
   0xb   :  { %v46_v47 = vld [vmem:[%s327_s1 + $0xf8] sm:$0xff]  ;;  %v196_v48 = vpack.c.bf16 %v28_v45, %v27_v44  ;;  %v29_v50 = vld [vmem:[%s327_s1 + $0x70] sm:$0xff]  ;;  %v47_v56 = vld [vmem:[%s329_s2] sm:$0x1] }
   0xc   :  { %v198_v49 = vpack.c.bf16 %v46_v47, %v45_v46  ;;  %v30_v51 = vld [vmem:[%s327_s1 + $0x78] sm:$0xff] }
   0xd   :  { %181 = vmatpush3.bf16.msra.mxu0 %v180_v22  ;;  %v200_v53 = vpack.c.bf16 %v30_v51, %v29_v50 }
   0xe   :  { %183 = vmatprep.subr.bf16.mxu0 %v182_v23 }
  0x11   :  { %185 = vmatpush3.bf16.msra.mxu0 %v184_v30 }
  0x12   :  { %187 = vmatprep.subr.bf16.mxu0 %v186_v31 }
  0x15   :  { %189 = vmatpush3.bf16.msra.mxu0 %v188_v36 }
  0x16   :  { %191 = vmatprep.subr.bf16.mxu0 %v190_v37 }
  0x19   :  { %193 = vmatpush3.bf16.msra.mxu0 %v192_v42 }
  0x1a   :  { %195 = vmatprep.subr.bf16.mxu0 %v194_v43 }
  0x1d   :  { %197 = vmatpush3.bf16.msra.mxu0 %v196_v48 }
  0x1e   :  { %199 = vmatprep.subr.bf16.mxu0 %v198_v49 }
  0x21   :  { %201 = vmatpush3.bf16.msra.mxu0 %v200_v53 }
  0x24   :  { %124 = vmatmul.mubr.f32.vlgmr.msra.gmra.mrb[0].mxu0 %v52_v54 }
  0xf7   :  { %v167_v55 = vpop.f32.mrb[0].mxu0 }
  0xf8   :  { %v168_v57 = vpop.f32.mrb[1].mxu0 }
  0xf9   :  { %v169_v58 = vadd.f32 %v168_v57, %v167_v55 }
  0xfb   :  { %v126_v59 = vadd.f32 %v169_v58, %v47_v56 }
  0xfd   :  { %v129_v60 = vmax.f32 %v126_v59, 0.0 }
  0xff   :  { %130 = vst [vmem:[%s330_s3] sm:$0x1] %v129_v60 }

</bundles_post_ra>
